<compile_context>
chip_gen: v5e
topology: v5e:2x2
jax: 0.10.0
libtpu: 0.0.40
codegen_flags: <defaults>
</compile_context>

<pallas_src>
import math
import functools

import jax
import jax.numpy as jnp
from jax import lax
from jax.experimental import pallas as pl
from jax.experimental.pallas import tpu as pltpu


# ----------------------------------------------------------------------------
# Pallas kernel: only the sequential LSTM recurrence.
# ----------------------------------------------------------------------------
def lstm_recurrence_kernel(gx_ref, w_hh_ref, h_out_ref, h_sc, c_sc, *, unroll):
    """One grid step == one (batch-block, time-chunk).

    gx_ref    : (Tc, Bb, 4H) bf16  precomputed x-gates (x@W_ih + statics + bias)
    w_hh_ref  : (H, 4H)      bf16  recurrent weight, constant index_map, Buffered(1)
    h_out_ref : (Tc, Bb, H)  bf16  per-timestep hidden states (lane-dense output)
    h_sc/c_sc : (Bb, H)      f32   VMEM carry across time chunks

    GRID CONTRACT (do not reorder): grid = (batch_blocks, time_chunks), time
    innermost and marked "arbitrary".  The h/c scratch carries state across the
    time chunks of ONE batch block and is reset when a new batch block starts
    (t_chunk == 0).  Swapping the grid order or marking time "parallel" would
    silently corrupt the recurrence.
    """
    t_chunk = pl.program_id(1)

    @pl.when(t_chunk == 0)
    def _():
        h_sc[...] = jnp.zeros_like(h_sc)
        c_sc[...] = jnp.zeros_like(c_sc)

    H = h_sc.shape[1]
    Tc = gx_ref.shape[0]
    w_hh = w_hh_ref[...]  # bf16, loaded once per chunk (VMEM-resident weight)

    def step(tt, carry):
        h, cc = carry  # f32 carries
        # Only the unavoidable serial dependency (h_{t-1} @ W_hh) stays in the
        # loop; bf16 operands keep the MXU at native speed, f32 accumulate.
        rec = jnp.dot(h.astype(jnp.bfloat16), w_hh,
                      preferred_element_type=jnp.float32)
        gates = gx_ref[tt].astype(jnp.float32) + rec            # (Bb, 4H) f32
        # Gate layout was permuted to [i, f, o, g] at prep time, so all three
        # sigmoid gates are one contiguous 3H slab (single fused EUP pass).
        ifo = jax.nn.sigmoid(gates[:, :3 * H])
        g = jnp.tanh(gates[:, 3 * H:])
        i = ifo[:, 0 * H:1 * H]
        f = ifo[:, 1 * H:2 * H]
        o = ifo[:, 2 * H:3 * H]
        c_new = f * cc + i * g
        h_new = o * jnp.tanh(c_new)
        h_out_ref[tt] = h_new.astype(h_out_ref.dtype)           # lane-dense store
        return (h_new, c_new)

    # Partial unroll: enough MXU/EUP/VPU co-scheduling within a step without the
    # vreg-spill blowup of fully unrolling a long chunk.
    h_fin, c_fin = lax.fori_loop(0, Tc, step, (h_sc[...], c_sc[...]),
                                 unroll=unroll)
    h_sc[...] = h_fin
    c_sc[...] = c_fin


# ----------------------------------------------------------------------------
# Sizing helpers
# ----------------------------------------------------------------------------
def _reorder_gates(arr, H):
    """Permute the 4H gate axis from PyTorch order [i, f, g, o] to [i, f, o, g]."""
    i = arr[..., 0 * H:1 * H]
    f = arr[..., 1 * H:2 * H]
    g = arr[..., 2 * H:3 * H]
    o = arr[..., 3 * H:4 * H]
    return jnp.concatenate([i, f, o, g], axis=-1)


def _vmem_capacity_bytes():
    try:
        info = pltpu.get_tpu_info()
        cap = getattr(info, "vmem_capacity_bytes", None)
        if cap:
            return int(cap)
    except Exception:
        pass
    return 64 << 20  # conservative default: v7x has 64 MiB per TensorCore


def _num_tensorcores_per_chip():
    try:
        kind = jax.devices()[0].device_kind.lower()
        if "7" in kind:  # v7x: 2 TensorCores per chip
            return 2
    except Exception:
        pass
    return 1


def _choose_batch_block(B, n_tc):
    """Per-grid-step batch block Bb."""
    if n_tc >= 2 and B >= 16:
        # >= 2 batch blocks so the "parallel" axis shards across both TCs (v7x).
        Bb = ((-(-B // 2)) + 7) // 8 * 8
        return min(Bb, 256)
    # Single-TC chips: don't split the batch unless it is huge (splitting just
    # serializes the grid and repeats per-chunk overhead). 256 fills the MXU M.
    return B if B <= 256 else 256


def _vmem_need_bytes(Tc, Bb, H):
    return (2 * Tc * Bb * 4 * H * 2    # gx bf16, double-buffered
            + 2 * Tc * Bb * H * 2      # h_out bf16, double-buffered
            + 1 * H * 4 * H * 2        # W_hh bf16, single-buffered (Buffered(1))
            + 2 * Bb * H * 4           # h / c f32 scratch
            + (2 << 20))               # slack for compiler-internal scratch


# ----------------------------------------------------------------------------
# Forward pass
# ----------------------------------------------------------------------------
def lstm_forward_pallas(x, c, params, *, t_chunk_max=32):
    """x: [B, T, c_in] f32; c: [B, n_static] or None; returns [B, T, c_out] f32."""
    x = x.astype(jnp.float32)
    B, T, c_in = x.shape
    H = params["w_hh"].shape[0]

    # One-time gate-column permutation: [i, f, g, o] -> [i, f, o, g].
    w_ih = _reorder_gates(params["w_ih"].astype(jnp.float32), H)   # (C, 4H)
    w_hh = _reorder_gates(params["w_hh"].astype(jnp.float32), H)   # (H, 4H)
    bias = _reorder_gates(params["bias"].astype(jnp.float32), H)   # (1, 4H)
    w_proj = params["w_proj"].astype(jnp.float32)                  # (H, c_out)
    b_proj = params["b_proj"].astype(jnp.float32)                  # (1, c_out)

    # Fold time-invariant static features into a per-row bias (no T-times
    # replicated concat materialized in HBM).
    static_gates = bias                                            # (1, 4H)
    if c is not None:
        static_gates = static_gates + c.astype(jnp.float32) @ w_ih[c_in:]  # (B,4H)

    # Hoisted input projection: one big MXU matmul over all T*B rows, emitted
    # time-major and stored in bf16 (halves the dominant HBM / VMEM stream).
    # TODO(synk): for very long T the materialized gx (T*B*8H bytes) can dominate
    # HBM capacity; chunk the gx computation if that ever becomes an issue.
    gx = (jnp.einsum("btc,cg->tbg", x, w_ih[:c_in],
                     preferred_element_type=jnp.float32)
          + static_gates[None]).astype(jnp.bfloat16)               # (T, B, 4H)

    # ---- tile sizing from a VMEM budget -----------------------------------
    n_tc = _num_tensorcores_per_chip()
    vmem_cap = _vmem_capacity_bytes()
    budget = int(vmem_cap * 0.75)      # leave headroom

    Bb = _choose_batch_block(B, n_tc)
    n_b = -(-B // Bb)
    B_pad = n_b * Bb

    Tc = max(1, min(t_chunk_max, T))
    while Tc > 1 and _vmem_need_bytes(Tc, Bb, H) > budget:
        Tc //= 2
    n_t = -(-T // Tc)
    T_pad = n_t * Tc

    if (T_pad, B_pad) != (T, B):
        gx = jnp.pad(gx, ((0, T_pad - T), (0, B_pad - B), (0, 0)))

    vmem_limit = int(min(vmem_cap,
                         max(_vmem_need_bytes(Tc, Bb, H) + (16 << 20), 32 << 20)))

    kernel = functools.partial(lstm_recurrence_kernel, unroll=min(8, Tc))

    h_all = pl.pallas_call(
        kernel,
        out_shape=jax.ShapeDtypeStruct((T_pad, B_pad, H), jnp.bfloat16),
        grid_spec=pltpu.PrefetchScalarGridSpec(
            num_scalar_prefetch=0,
            # GRID CONTRACT: batch blocks outer ("parallel"), time chunks inner
            # ("arbitrary").  Do not reorder — see kernel docstring.
            grid=(n_b, n_t),
            in_specs=[
                pl.BlockSpec((Tc, Bb, 4 * H), lambda b, t: (t, b, 0)),   # gx chunk
                # Constant index_map + single buffer: W_hh fetched once, stays
                # VMEM-resident; no pointless second buffer.
                pl.BlockSpec((H, 4 * H), lambda b, t: (0, 0),
                             pipeline_mode=pl.Buffered(1)),
            ],
            out_specs=pl.BlockSpec((Tc, Bb, H), lambda b, t: (t, b, 0)),
            scratch_shapes=[
                pltpu.VMEM((Bb, H), jnp.float32),   # h carry (f32 across chunks)
                pltpu.VMEM((Bb, H), jnp.float32),   # c carry
            ],
        ),
        compiler_params=pltpu.CompilerParams(
            dimension_semantics=("parallel", "arbitrary"),
            vmem_limit_bytes=vmem_limit),
    )(gx, w_hh.astype(jnp.bfloat16))

    h_all = h_all[:T, :B]   # drop time / batch padding

    # Hoisted output projection (dropout is identity at p=0.0): one batched
    # matmul, emitted batch-first (output transpose fused into the matmul).
    y = jnp.einsum("tbh,ho->bto", h_all, w_proj.astype(jnp.bfloat16),
                   preferred_element_type=jnp.float32) + b_proj[None]
    return y


# ----------------------------------------------------------------------------
# Params + pure-JAX reference (PyTorch gate order) for correctness checking.
# ----------------------------------------------------------------------------
def init_params(key, c_total, hidden_size, c_out, initial_forget_bias=None):
    """Deterministic init matching nn.LSTM / nn.Linear parameter shapes."""
    k = 1.0 / math.sqrt(hidden_size)
    ks = jax.random.split(key, 6)
    w_ih = jax.random.uniform(ks[0], (4 * hidden_size, c_total), jnp.float32, -k, k)
    w_hh = jax.random.uniform(ks[1], (4 * hidden_size, hidden_size), jnp.float32, -k, k)
    b_ih = jax.random.uniform(ks[2], (4 * hidden_size,), jnp.float32, -k, k)
    b_hh = jax.random.uniform(ks[3], (4 * hidden_size,), jnp.float32, -k, k)
    if initial_forget_bias is not None:  # reset_parameters()
        b_hh = b_hh.at[hidden_size:2 * hidden_size].set(initial_forget_bias)
    w_proj = jax.random.uniform(ks[4], (c_out, hidden_size), jnp.float32, -k, k)
    b_proj = jax.random.uniform(ks[5], (c_out,), jnp.float32, -k, k)
    return {
        "w_ih": w_ih.T,                        # (C, 4H)   PyTorch gate order [i,f,g,o]
        "w_hh": w_hh.T,                        # (H, 4H)
        "bias": (b_ih + b_hh)[None, :],        # (1, 4H)
        "w_proj": w_proj.T,                    # (H, c_out)
        "b_proj": b_proj[None, :],             # (1, c_out)
    }


def lstm_forward_ref(x, c, params):
    """Pure-JAX f32 reference (lax.scan, concat path)."""
    if c is not None:
        B, T, _ = x.shape
        c_exp = jnp.broadcast_to(c[:, None, :], (B, T, c.shape[-1]))
        x = jnp.concatenate([x, c_exp], axis=-1)
    B = x.shape[0]
    H = params["w_hh"].shape[0]

    def step(carry, x_t):
        h, cc = carry
        gates = x_t @ params["w_ih"] + h @ params["w_hh"] + params["bias"]
        i = jax.nn.sigmoid(gates[:, 0 * H:1 * H])
        f = jax.nn.sigmoid(gates[:, 1 * H:2 * H])
        g = jnp.tanh(gates[:, 2 * H:3 * H])
        o = jax.nn.sigmoid(gates[:, 3 * H:4 * H])
        c_new = f * cc + i * g
        h_new = o * jnp.tanh(c_new)
        return (h_new, c_new), h_new

    h0 = jnp.zeros((B, H), jnp.float32)
    (_, _), hs = lax.scan(step, (h0, h0), jnp.transpose(x, (1, 0, 2)))
    y = hs @ params["w_proj"] + params["b_proj"]
    return jnp.transpose(y, (1, 0, 2))


if __name__ == "__main__":
    # Small shapes implied by the module's forward: batch_x [B, T, c_in],
    # batch_c [B, n_static] statics concatenated onto the feature axis.
    B, T, c_in, n_static, hidden, c_out = 2, 8, 4, 3, 32, 2
    initial_forget_bias = 3.0
    dropout = 0.0  # identity

    key = jax.random.PRNGKey(0)
    kx, kc, kp = jax.random.split(key, 3)
    batch_x = jax.random.normal(kx, (B, T, c_in), jnp.float32)
    batch_c = jax.random.normal(kc, (B, n_static), jnp.float32)

    params = init_params(kp, c_in + n_static, hidden, c_out, initial_forget_bias)

    fwd = jax.jit(functools.partial(lstm_forward_pallas, params=params))
    y = fwd(batch_x, batch_c)
    jax.block_until_ready(y)

    y_ref = lstm_forward_ref(batch_x, batch_c, params)
    assert y.shape == (B, T, c_out)
    # bf16 gx / recurrent-matmul operands / h_out compound slight rounding over
    # the T steps; carries and accumulations stay f32, so a loose tolerance vs
    # the f32 reference is expected and sufficient.
    assert jnp.allclose(y, y_ref, atol=5e-2, rtol=5e-2), (
        float(jnp.max(jnp.abs(y - y_ref))))

    print("KERNEL_OK")
</pallas_src>

<mosaic_0001>
module attributes {stable_mosaic.version = 11 : i64} {
  func.func @lstm_recurrence_kernel(%arg0: i32, %arg1: i32, %arg2: memref<8x2x128xbf16, #tpu.memory_space<vmem>>, %arg3: memref<32x128xbf16, #tpu.memory_space<vmem>>, %arg4: memref<8x2x32xbf16, #tpu.memory_space<vmem>>, %arg5: memref<2x32xf32, #tpu.memory_space<vmem>>, %arg6: memref<2x32xf32, #tpu.memory_space<vmem>>) attributes {dimension_semantics = [#tpu.dimension_semantics<parallel>, #tpu.dimension_semantics<arbitrary>], iteration_bounds = array<i64: 1, 1>, scalar_prefetch = 0 : i64, scratch_operands = 2 : i64, tpu.core_type = #tpu.core_type<tc>, window_params = [{transform_indices = @transform_0, window_bounds = array<i64: 8, 2, 128>}, {pipeline_mode = #tpu.pipeline_mode<synchronous>, transform_indices = @transform_1, window_bounds = array<i64: 32, 128>}, {transform_indices = @transform_2, window_bounds = array<i64: 8, 2, 32>}]} {
    %c0_i32 = arith.constant 0 : i32
    %0 = arith.cmpi eq, %arg1, %c0_i32 : i32
    %1 = arith.extui %0 : i1 to i32
    %c0_i32_0 = arith.constant 0 : i32
    %2 = arith.cmpi ne, %1, %c0_i32_0 : i32
    scf.if %2 {
      %cst_58 = arith.constant 0.000000e+00 : f32
      %232 = vector.broadcast %cst_58 : f32 to vector<2x32xf32>
      %c0_59 = arith.constant 0 : index
      %c0_60 = arith.constant 0 : index
      %233 = vector.load %arg5[%c0_59, %c0_60] : memref<2x32xf32, #tpu.memory_space<vmem>>, vector<2x32xf32>
      tpu.vector_store %arg5[%c0_59, %c0_60], %232 {strides = array<i32>} : memref<2x32xf32, #tpu.memory_space<vmem>>, vector<2x32xf32>,
      %cst_61 = arith.constant 0.000000e+00 : f32
      %234 = vector.broadcast %cst_61 : f32 to vector<2x32xf32>
      %c0_62 = arith.constant 0 : index
      %c0_63 = arith.constant 0 : index
      %235 = vector.load %arg6[%c0_62, %c0_63] : memref<2x32xf32, #tpu.memory_space<vmem>>, vector<2x32xf32>
      tpu.vector_store %arg6[%c0_62, %c0_63], %234 {strides = array<i32>} : memref<2x32xf32, #tpu.memory_space<vmem>>, vector<2x32xf32>,
    } else {
    }
    %c0 = arith.constant 0 : index
    %c0_1 = arith.constant 0 : index
    %3 = vector.load %arg3[%c0, %c0_1] : memref<32x128xbf16, #tpu.memory_space<vmem>>, vector<32x128xbf16>
    %c0_2 = arith.constant 0 : index
    %c0_3 = arith.constant 0 : index
    %4 = vector.load %arg5[%c0_2, %c0_3] : memref<2x32xf32, #tpu.memory_space<vmem>>, vector<2x32xf32>
    %c0_4 = arith.constant 0 : index
    %c0_5 = arith.constant 0 : index
    %5 = vector.load %arg6[%c0_4, %c0_5] : memref<2x32xf32, #tpu.memory_space<vmem>>, vector<2x32xf32>
    %c0_i32_6 = arith.constant 0 : i32
    %6 = arith.truncf %4 : vector<2x32xf32> to vector<2x32xbf16>
    %cst = arith.constant dense<0.000000e+00> : vector<2x128xf32>
    %7 = tpu.matmul %6, %3, %cst {dimension_numbers = #tpu.dot_dimension_numbers<[1], [0], [0], [1], [0, 0, 1, 1], [], []>} : vector<2x32xbf16>, vector<32x128xbf16>, vector<2x128xf32> -> vector<2x128xf32>
    %8 = arith.index_cast %c0_i32_6 : i32 to index
    %c0_7 = arith.constant 0 : index
    %c0_8 = arith.constant 0 : index
    %9 = vector.load %arg2[%8, %c0_7, %c0_8] : memref<8x2x128xbf16, #tpu.memory_space<vmem>>, vector<1x2x128xbf16>
    %10 = vector.shape_cast %9 : vector<1x2x128xbf16> to vector<2x128xbf16>
    %11 = arith.extf %10 : vector<2x128xbf16> to vector<2x128xf32>
    %12 = arith.addf %11, %7 : vector<2x128xf32>
    %13 = vector.extract_strided_slice %12 {offsets = [0, 0], sizes = [2, 96], strides = [1, 1]} : vector<2x128xf32> to vector<2x96xf32>
    %14 = arith.negf %13 : vector<2x96xf32>
    %15 = math.exp %14 : vector<2x96xf32>
    %cst_9 = arith.constant 1.000000e+00 : f32
    %16 = vector.broadcast %cst_9 : f32 to vector<2x96xf32>
    %17 = arith.addf %16, %15 : vector<2x96xf32>
    %18 = arith.divf %16, %17 : vector<2x96xf32>
    %19 = vector.extract_strided_slice %12 {offsets = [0, 96], sizes = [2, 32], strides = [1, 1]} : vector<2x128xf32> to vector<2x32xf32>
    %20 = math.tanh %19 : vector<2x32xf32>
    %21 = vector.extract_strided_slice %18 {offsets = [0, 0], sizes = [2, 32], strides = [1, 1]} : vector<2x96xf32> to vector<2x32xf32>
    %22 = vector.extract_strided_slice %18 {offsets = [0, 32], sizes = [2, 32], strides = [1, 1]} : vector<2x96xf32> to vector<2x32xf32>
    %23 = vector.extract_strided_slice %18 {offsets = [0, 64], sizes = [2, 32], strides = [1, 1]} : vector<2x96xf32> to vector<2x32xf32>
    %24 = arith.mulf %22, %5 : vector<2x32xf32>
    %25 = arith.mulf %21, %20 : vector<2x32xf32>
    %26 = arith.addf %24, %25 : vector<2x32xf32>
    %27 = math.tanh %26 : vector<2x32xf32>
    %28 = arith.mulf %23, %27 : vector<2x32xf32>
    %29 = arith.truncf %28 : vector<2x32xf32> to vector<2x32xbf16>
    %30 = arith.index_cast %c0_i32_6 : i32 to index
    %c0_10 = arith.constant 0 : index
    %c0_11 = arith.constant 0 : index
    %31 = vector.load %arg4[%30, %c0_10, %c0_11] : memref<8x2x32xbf16, #tpu.memory_space<vmem>>, vector<1x2x32xbf16>
    %32 = vector.shape_cast %31 : vector<1x2x32xbf16> to vector<2x32xbf16>
    %33 = vector.shape_cast %29 : vector<2x32xbf16> to vector<1x2x32xbf16>
    tpu.vector_store %arg4[%30, %c0_10, %c0_11], %33 {strides = array<i32>} : memref<8x2x32xbf16, #tpu.memory_space<vmem>>, vector<1x2x32xbf16>,
    %c1_i32 = arith.constant 1 : i32
    %34 = arith.truncf %28 : vector<2x32xf32> to vector<2x32xbf16>
    %cst_12 = arith.constant dense<0.000000e+00> : vector<2x128xf32>
    %35 = tpu.matmul %34, %3, %cst_12 {dimension_numbers = #tpu.dot_dimension_numbers<[1], [0], [0], [1], [0, 0, 1, 1], [], []>} : vector<2x32xbf16>, vector<32x128xbf16>, vector<2x128xf32> -> vector<2x128xf32>
    %36 = arith.index_cast %c1_i32 : i32 to index
    %c0_13 = arith.constant 0 : index
    %c0_14 = arith.constant 0 : index
    %37 = vector.load %arg2[%36, %c0_13, %c0_14] : memref<8x2x128xbf16, #tpu.memory_space<vmem>>, vector<1x2x128xbf16>
    %38 = vector.shape_cast %37 : vector<1x2x128xbf16> to vector<2x128xbf16>
    %39 = arith.extf %38 : vector<2x128xbf16> to vector<2x128xf32>
    %40 = arith.addf %39, %35 : vector<2x128xf32>
    %41 = vector.extract_strided_slice %40 {offsets = [0, 0], sizes = [2, 96], strides = [1, 1]} : vector<2x128xf32> to vector<2x96xf32>
    %42 = arith.negf %41 : vector<2x96xf32>
    %43 = math.exp %42 : vector<2x96xf32>
    %cst_15 = arith.constant 1.000000e+00 : f32
    %44 = vector.broadcast %cst_15 : f32 to vector<2x96xf32>
    %45 = arith.addf %44, %43 : vector<2x96xf32>
    %46 = arith.divf %44, %45 : vector<2x96xf32>
    %47 = vector.extract_strided_slice %40 {offsets = [0, 96], sizes = [2, 32], strides = [1, 1]} : vector<2x128xf32> to vector<2x32xf32>
    %48 = math.tanh %47 : vector<2x32xf32>
    %49 = vector.extract_strided_slice %46 {offsets = [0, 0], sizes = [2, 32], strides = [1, 1]} : vector<2x96xf32> to vector<2x32xf32>
    %50 = vector.extract_strided_slice %46 {offsets = [0, 32], sizes = [2, 32], strides = [1, 1]} : vector<2x96xf32> to vector<2x32xf32>
    %51 = vector.extract_strided_slice %46 {offsets = [0, 64], sizes = [2, 32], strides = [1, 1]} : vector<2x96xf32> to vector<2x32xf32>
    %52 = arith.mulf %50, %26 : vector<2x32xf32>
    %53 = arith.mulf %49, %48 : vector<2x32xf32>
    %54 = arith.addf %52, %53 : vector<2x32xf32>
    %55 = math.tanh %54 : vector<2x32xf32>
    %56 = arith.mulf %51, %55 : vector<2x32xf32>
    %57 = arith.truncf %56 : vector<2x32xf32> to vector<2x32xbf16>
    %58 = arith.index_cast %c1_i32 : i32 to index
    %c0_16 = arith.constant 0 : index
    %c0_17 = arith.constant 0 : index
    %59 = vector.load %arg4[%58, %c0_16, %c0_17] : memref<8x2x32xbf16, #tpu.memory_space<vmem>>, vector<1x2x32xbf16>
    %60 = vector.shape_cast %59 : vector<1x2x32xbf16> to vector<2x32xbf16>
    %61 = vector.shape_cast %57 : vector<2x32xbf16> to vector<1x2x32xbf16>
    tpu.vector_store %arg4[%58, %c0_16, %c0_17], %61 {strides = array<i32>} : memref<8x2x32xbf16, #tpu.memory_space<vmem>>, vector<1x2x32xbf16>,
    %c2_i32 = arith.constant 2 : i32
    %62 = arith.truncf %56 : vector<2x32xf32> to vector<2x32xbf16>
    %cst_18 = arith.constant dense<0.000000e+00> : vector<2x128xf32>
    %63 = tpu.matmul %62, %3, %cst_18 {dimension_numbers = #tpu.dot_dimension_numbers<[1], [0], [0], [1], [0, 0, 1, 1], [], []>} : vector<2x32xbf16>, vector<32x128xbf16>, vector<2x128xf32> -> vector<2x128xf32>
    %64 = arith.index_cast %c2_i32 : i32 to index
    %c0_19 = arith.constant 0 : index
    %c0_20 = arith.constant 0 : index
    %65 = vector.load %arg2[%64, %c0_19, %c0_20] : memref<8x2x128xbf16, #tpu.memory_space<vmem>>, vector<1x2x128xbf16>
    %66 = vector.shape_cast %65 : vector<1x2x128xbf16> to vector<2x128xbf16>
    %67 = arith.extf %66 : vector<2x128xbf16> to vector<2x128xf32>
    %68 = arith.addf %67, %63 : vector<2x128xf32>
    %69 = vector.extract_strided_slice %68 {offsets = [0, 0], sizes = [2, 96], strides = [1, 1]} : vector<2x128xf32> to vector<2x96xf32>
    %70 = arith.negf %69 : vector<2x96xf32>
    %71 = math.exp %70 : vector<2x96xf32>
    %cst_21 = arith.constant 1.000000e+00 : f32
    %72 = vector.broadcast %cst_21 : f32 to vector<2x96xf32>
    %73 = arith.addf %72, %71 : vector<2x96xf32>
    %74 = arith.divf %72, %73 : vector<2x96xf32>
    %75 = vector.extract_strided_slice %68 {offsets = [0, 96], sizes = [2, 32], strides = [1, 1]} : vector<2x128xf32> to vector<2x32xf32>
    %76 = math.tanh %75 : vector<2x32xf32>
    %77 = vector.extract_strided_slice %74 {offsets = [0, 0], sizes = [2, 32], strides = [1, 1]} : vector<2x96xf32> to vector<2x32xf32>
    %78 = vector.extract_strided_slice %74 {offsets = [0, 32], sizes = [2, 32], strides = [1, 1]} : vector<2x96xf32> to vector<2x32xf32>
    %79 = vector.extract_strided_slice %74 {offsets = [0, 64], sizes = [2, 32], strides = [1, 1]} : vector<2x96xf32> to vector<2x32xf32>
    %80 = arith.mulf %78, %54 : vector<2x32xf32>
    %81 = arith.mulf %77, %76 : vector<2x32xf32>
    %82 = arith.addf %80, %81 : vector<2x32xf32>
    %83 = math.tanh %82 : vector<2x32xf32>
    %84 = arith.mulf %79, %83 : vector<2x32xf32>
    %85 = arith.truncf %84 : vector<2x32xf32> to vector<2x32xbf16>
    %86 = arith.index_cast %c2_i32 : i32 to index
    %c0_22 = arith.constant 0 : index
    %c0_23 = arith.constant 0 : index
    %87 = vector.load %arg4[%86, %c0_22, %c0_23] : memref<8x2x32xbf16, #tpu.memory_space<vmem>>, vector<1x2x32xbf16>
    %88 = vector.shape_cast %87 : vector<1x2x32xbf16> to vector<2x32xbf16>
    %89 = vector.shape_cast %85 : vector<2x32xbf16> to vector<1x2x32xbf16>
    tpu.vector_store %arg4[%86, %c0_22, %c0_23], %89 {strides = array<i32>} : memref<8x2x32xbf16, #tpu.memory_space<vmem>>, vector<1x2x32xbf16>,
    %c3_i32 = arith.constant 3 : i32
    %90 = arith.truncf %84 : vector<2x32xf32> to vector<2x32xbf16>
    %cst_24 = arith.constant dense<0.000000e+00> : vector<2x128xf32>
    %91 = tpu.matmul %90, %3, %cst_24 {dimension_numbers = #tpu.dot_dimension_numbers<[1], [0], [0], [1], [0, 0, 1, 1], [], []>} : vector<2x32xbf16>, vector<32x128xbf16>, vector<2x128xf32> -> vector<2x128xf32>
    %92 = arith.index_cast %c3_i32 : i32 to index
    %c0_25 = arith.constant 0 : index
    %c0_26 = arith.constant 0 : index
    %93 = vector.load %arg2[%92, %c0_25, %c0_26] : memref<8x2x128xbf16, #tpu.memory_space<vmem>>, vector<1x2x128xbf16>
    %94 = vector.shape_cast %93 : vector<1x2x128xbf16> to vector<2x128xbf16>
    %95 = arith.extf %94 : vector<2x128xbf16> to vector<2x128xf32>
    %96 = arith.addf %95, %91 : vector<2x128xf32>
    %97 = vector.extract_strided_slice %96 {offsets = [0, 0], sizes = [2, 96], strides = [1, 1]} : vector<2x128xf32> to vector<2x96xf32>
    %98 = arith.negf %97 : vector<2x96xf32>
    %99 = math.exp %98 : vector<2x96xf32>
    %cst_27 = arith.constant 1.000000e+00 : f32
    %100 = vector.broadcast %cst_27 : f32 to vector<2x96xf32>
    %101 = arith.addf %100, %99 : vector<2x96xf32>
    %102 = arith.divf %100, %101 : vector<2x96xf32>
    %103 = vector.extract_strided_slice %96 {offsets = [0, 96], sizes = [2, 32], strides = [1, 1]} : vector<2x128xf32> to vector<2x32xf32>
    %104 = math.tanh %103 : vector<2x32xf32>
    %105 = vector.extract_strided_slice %102 {offsets = [0, 0], sizes = [2, 32], strides = [1, 1]} : vector<2x96xf32> to vector<2x32xf32>
    %106 = vector.extract_strided_slice %102 {offsets = [0, 32], sizes = [2, 32], strides = [1, 1]} : vector<2x96xf32> to vector<2x32xf32>
    %107 = vector.extract_strided_slice %102 {offsets = [0, 64], sizes = [2, 32], strides = [1, 1]} : vector<2x96xf32> to vector<2x32xf32>
    %108 = arith.mulf %106, %82 : vector<2x32xf32>
    %109 = arith.mulf %105, %104 : vector<2x32xf32>
    %110 = arith.addf %108, %109 : vector<2x32xf32>
    %111 = math.tanh %110 : vector<2x32xf32>
    %112 = arith.mulf %107, %111 : vector<2x32xf32>
    %113 = arith.truncf %112 : vector<2x32xf32> to vector<2x32xbf16>
    %114 = arith.index_cast %c3_i32 : i32 to index
    %c0_28 = arith.constant 0 : index
    %c0_29 = arith.constant 0 : index
    %115 = vector.load %arg4[%114, %c0_28, %c0_29] : memref<8x2x32xbf16, #tpu.memory_space<vmem>>, vector<1x2x32xbf16>
    %116 = vector.shape_cast %115 : vector<1x2x32xbf16> to vector<2x32xbf16>
    %117 = vector.shape_cast %113 : vector<2x32xbf16> to vector<1x2x32xbf16>
    tpu.vector_store %arg4[%114, %c0_28, %c0_29], %117 {strides = array<i32>} : memref<8x2x32xbf16, #tpu.memory_space<vmem>>, vector<1x2x32xbf16>,
    %c4_i32 = arith.constant 4 : i32
    %118 = arith.truncf %112 : vector<2x32xf32> to vector<2x32xbf16>
    %cst_30 = arith.constant dense<0.000000e+00> : vector<2x128xf32>
    %119 = tpu.matmul %118, %3, %cst_30 {dimension_numbers = #tpu.dot_dimension_numbers<[1], [0], [0], [1], [0, 0, 1, 1], [], []>} : vector<2x32xbf16>, vector<32x128xbf16>, vector<2x128xf32> -> vector<2x128xf32>
    %120 = arith.index_cast %c4_i32 : i32 to index
    %c0_31 = arith.constant 0 : index
    %c0_32 = arith.constant 0 : index
    %121 = vector.load %arg2[%120, %c0_31, %c0_32] : memref<8x2x128xbf16, #tpu.memory_space<vmem>>, vector<1x2x128xbf16>
    %122 = vector.shape_cast %121 : vector<1x2x128xbf16> to vector<2x128xbf16>
    %123 = arith.extf %122 : vector<2x128xbf16> to vector<2x128xf32>
    %124 = arith.addf %123, %119 : vector<2x128xf32>
    %125 = vector.extract_strided_slice %124 {offsets = [0, 0], sizes = [2, 96], strides = [1, 1]} : vector<2x128xf32> to vector<2x96xf32>
    %126 = arith.negf %125 : vector<2x96xf32>
    %127 = math.exp %126 : vector<2x96xf32>
    %cst_33 = arith.constant 1.000000e+00 : f32
    %128 = vector.broadcast %cst_33 : f32 to vector<2x96xf32>
    %129 = arith.addf %128, %127 : vector<2x96xf32>
    %130 = arith.divf %128, %129 : vector<2x96xf32>
    %131 = vector.extract_strided_slice %124 {offsets = [0, 96], sizes = [2, 32], strides = [1, 1]} : vector<2x128xf32> to vector<2x32xf32>
    %132 = math.tanh %131 : vector<2x32xf32>
    %133 = vector.extract_strided_slice %130 {offsets = [0, 0], sizes = [2, 32], strides = [1, 1]} : vector<2x96xf32> to vector<2x32xf32>
    %134 = vector.extract_strided_slice %130 {offsets = [0, 32], sizes = [2, 32], strides = [1, 1]} : vector<2x96xf32> to vector<2x32xf32>
    %135 = vector.extract_strided_slice %130 {offsets = [0, 64], sizes = [2, 32], strides = [1, 1]} : vector<2x96xf32> to vector<2x32xf32>
    %136 = arith.mulf %134, %110 : vector<2x32xf32>
    %137 = arith.mulf %133, %132 : vector<2x32xf32>
    %138 = arith.addf %136, %137 : vector<2x32xf32>
    %139 = math.tanh %138 : vector<2x32xf32>
    %140 = arith.mulf %135, %139 : vector<2x32xf32>
    %141 = arith.truncf %140 : vector<2x32xf32> to vector<2x32xbf16>
    %142 = arith.index_cast %c4_i32 : i32 to index
    %c0_34 = arith.constant 0 : index
    %c0_35 = arith.constant 0 : index
    %143 = vector.load %arg4[%142, %c0_34, %c0_35] : memref<8x2x32xbf16, #tpu.memory_space<vmem>>, vector<1x2x32xbf16>
    %144 = vector.shape_cast %143 : vector<1x2x32xbf16> to vector<2x32xbf16>
    %145 = vector.shape_cast %141 : vector<2x32xbf16> to vector<1x2x32xbf16>
    tpu.vector_store %arg4[%142, %c0_34, %c0_35], %145 {strides = array<i32>} : memref<8x2x32xbf16, #tpu.memory_space<vmem>>, vector<1x2x32xbf16>,
    %c5_i32 = arith.constant 5 : i32
    %146 = arith.truncf %140 : vector<2x32xf32> to vector<2x32xbf16>
    %cst_36 = arith.constant dense<0.000000e+00> : vector<2x128xf32>
    %147 = tpu.matmul %146, %3, %cst_36 {dimension_numbers = #tpu.dot_dimension_numbers<[1], [0], [0], [1], [0, 0, 1, 1], [], []>} : vector<2x32xbf16>, vector<32x128xbf16>, vector<2x128xf32> -> vector<2x128xf32>
    %148 = arith.index_cast %c5_i32 : i32 to index
    %c0_37 = arith.constant 0 : index
    %c0_38 = arith.constant 0 : index
    %149 = vector.load %arg2[%148, %c0_37, %c0_38] : memref<8x2x128xbf16, #tpu.memory_space<vmem>>, vector<1x2x128xbf16>
    %150 = vector.shape_cast %149 : vector<1x2x128xbf16> to vector<2x128xbf16>
    %151 = arith.extf %150 : vector<2x128xbf16> to vector<2x128xf32>
    %152 = arith.addf %151, %147 : vector<2x128xf32>
    %153 = vector.extract_strided_slice %152 {offsets = [0, 0], sizes = [2, 96], strides = [1, 1]} : vector<2x128xf32> to vector<2x96xf32>
    %154 = arith.negf %153 : vector<2x96xf32>
    %155 = math.exp %154 : vector<2x96xf32>
    %cst_39 = arith.constant 1.000000e+00 : f32
    %156 = vector.broadcast %cst_39 : f32 to vector<2x96xf32>
    %157 = arith.addf %156, %155 : vector<2x96xf32>
    %158 = arith.divf %156, %157 : vector<2x96xf32>
    %159 = vector.extract_strided_slice %152 {offsets = [0, 96], sizes = [2, 32], strides = [1, 1]} : vector<2x128xf32> to vector<2x32xf32>
    %160 = math.tanh %159 : vector<2x32xf32>
    %161 = vector.extract_strided_slice %158 {offsets = [0, 0], sizes = [2, 32], strides = [1, 1]} : vector<2x96xf32> to vector<2x32xf32>
    %162 = vector.extract_strided_slice %158 {offsets = [0, 32], sizes = [2, 32], strides = [1, 1]} : vector<2x96xf32> to vector<2x32xf32>
    %163 = vector.extract_strided_slice %158 {offsets = [0, 64], sizes = [2, 32], strides = [1, 1]} : vector<2x96xf32> to vector<2x32xf32>
    %164 = arith.mulf %162, %138 : vector<2x32xf32>
    %165 = arith.mulf %161, %160 : vector<2x32xf32>
    %166 = arith.addf %164, %165 : vector<2x32xf32>
    %167 = math.tanh %166 : vector<2x32xf32>
    %168 = arith.mulf %163, %167 : vector<2x32xf32>
    %169 = arith.truncf %168 : vector<2x32xf32> to vector<2x32xbf16>
    %170 = arith.index_cast %c5_i32 : i32 to index
    %c0_40 = arith.constant 0 : index
    %c0_41 = arith.constant 0 : index
    %171 = vector.load %arg4[%170, %c0_40, %c0_41] : memref<8x2x32xbf16, #tpu.memory_space<vmem>>, vector<1x2x32xbf16>
    %172 = vector.shape_cast %171 : vector<1x2x32xbf16> to vector<2x32xbf16>
    %173 = vector.shape_cast %169 : vector<2x32xbf16> to vector<1x2x32xbf16>
    tpu.vector_store %arg4[%170, %c0_40, %c0_41], %173 {strides = array<i32>} : memref<8x2x32xbf16, #tpu.memory_space<vmem>>, vector<1x2x32xbf16>,
    %c6_i32 = arith.constant 6 : i32
    %174 = arith.truncf %168 : vector<2x32xf32> to vector<2x32xbf16>
    %cst_42 = arith.constant dense<0.000000e+00> : vector<2x128xf32>
    %175 = tpu.matmul %174, %3, %cst_42 {dimension_numbers = #tpu.dot_dimension_numbers<[1], [0], [0], [1], [0, 0, 1, 1], [], []>} : vector<2x32xbf16>, vector<32x128xbf16>, vector<2x128xf32> -> vector<2x128xf32>
    %176 = arith.index_cast %c6_i32 : i32 to index
    %c0_43 = arith.constant 0 : index
    %c0_44 = arith.constant 0 : index
    %177 = vector.load %arg2[%176, %c0_43, %c0_44] : memref<8x2x128xbf16, #tpu.memory_space<vmem>>, vector<1x2x128xbf16>
    %178 = vector.shape_cast %177 : vector<1x2x128xbf16> to vector<2x128xbf16>
    %179 = arith.extf %178 : vector<2x128xbf16> to vector<2x128xf32>
    %180 = arith.addf %179, %175 : vector<2x128xf32>
    %181 = vector.extract_strided_slice %180 {offsets = [0, 0], sizes = [2, 96], strides = [1, 1]} : vector<2x128xf32> to vector<2x96xf32>
    %182 = arith.negf %181 : vector<2x96xf32>
    %183 = math.exp %182 : vector<2x96xf32>
    %cst_45 = arith.constant 1.000000e+00 : f32
    %184 = vector.broadcast %cst_45 : f32 to vector<2x96xf32>
    %185 = arith.addf %184, %183 : vector<2x96xf32>
    %186 = arith.divf %184, %185 : vector<2x96xf32>
    %187 = vector.extract_strided_slice %180 {offsets = [0, 96], sizes = [2, 32], strides = [1, 1]} : vector<2x128xf32> to vector<2x32xf32>
    %188 = math.tanh %187 : vector<2x32xf32>
    %189 = vector.extract_strided_slice %186 {offsets = [0, 0], sizes = [2, 32], strides = [1, 1]} : vector<2x96xf32> to vector<2x32xf32>
    %190 = vector.extract_strided_slice %186 {offsets = [0, 32], sizes = [2, 32], strides = [1, 1]} : vector<2x96xf32> to vector<2x32xf32>
    %191 = vector.extract_strided_slice %186 {offsets = [0, 64], sizes = [2, 32], strides = [1, 1]} : vector<2x96xf32> to vector<2x32xf32>
    %192 = arith.mulf %190, %166 : vector<2x32xf32>
    %193 = arith.mulf %189, %188 : vector<2x32xf32>
    %194 = arith.addf %192, %193 : vector<2x32xf32>
    %195 = math.tanh %194 : vector<2x32xf32>
    %196 = arith.mulf %191, %195 : vector<2x32xf32>
    %197 = arith.truncf %196 : vector<2x32xf32> to vector<2x32xbf16>
    %198 = arith.index_cast %c6_i32 : i32 to index
    %c0_46 = arith.constant 0 : index
    %c0_47 = arith.constant 0 : index
    %199 = vector.load %arg4[%198, %c0_46, %c0_47] : memref<8x2x32xbf16, #tpu.memory_space<vmem>>, vector<1x2x32xbf16>
    %200 = vector.shape_cast %199 : vector<1x2x32xbf16> to vector<2x32xbf16>
    %201 = vector.shape_cast %197 : vector<2x32xbf16> to vector<1x2x32xbf16>
    tpu.vector_store %arg4[%198, %c0_46, %c0_47], %201 {strides = array<i32>} : memref<8x2x32xbf16, #tpu.memory_space<vmem>>, vector<1x2x32xbf16>,
    %c7_i32 = arith.constant 7 : i32
    %202 = arith.truncf %196 : vector<2x32xf32> to vector<2x32xbf16>
    %cst_48 = arith.constant dense<0.000000e+00> : vector<2x128xf32>
    %203 = tpu.matmul %202, %3, %cst_48 {dimension_numbers = #tpu.dot_dimension_numbers<[1], [0], [0], [1], [0, 0, 1, 1], [], []>} : vector<2x32xbf16>, vector<32x128xbf16>, vector<2x128xf32> -> vector<2x128xf32>
    %204 = arith.index_cast %c7_i32 : i32 to index
    %c0_49 = arith.constant 0 : index
    %c0_50 = arith.constant 0 : index
    %205 = vector.load %arg2[%204, %c0_49, %c0_50] : memref<8x2x128xbf16, #tpu.memory_space<vmem>>, vector<1x2x128xbf16>
    %206 = vector.shape_cast %205 : vector<1x2x128xbf16> to vector<2x128xbf16>
    %207 = arith.extf %206 : vector<2x128xbf16> to vector<2x128xf32>
    %208 = arith.addf %207, %203 : vector<2x128xf32>
    %209 = vector.extract_strided_slice %208 {offsets = [0, 0], sizes = [2, 96], strides = [1, 1]} : vector<2x128xf32> to vector<2x96xf32>
    %210 = arith.negf %209 : vector<2x96xf32>
    %211 = math.exp %210 : vector<2x96xf32>
    %cst_51 = arith.constant 1.000000e+00 : f32
    %212 = vector.broadcast %cst_51 : f32 to vector<2x96xf32>
    %213 = arith.addf %212, %211 : vector<2x96xf32>
    %214 = arith.divf %212, %213 : vector<2x96xf32>
    %215 = vector.extract_strided_slice %208 {offsets = [0, 96], sizes = [2, 32], strides = [1, 1]} : vector<2x128xf32> to vector<2x32xf32>
    %216 = math.tanh %215 : vector<2x32xf32>
    %217 = vector.extract_strided_slice %214 {offsets = [0, 0], sizes = [2, 32], strides = [1, 1]} : vector<2x96xf32> to vector<2x32xf32>
    %218 = vector.extract_strided_slice %214 {offsets = [0, 32], sizes = [2, 32], strides = [1, 1]} : vector<2x96xf32> to vector<2x32xf32>
    %219 = vector.extract_strided_slice %214 {offsets = [0, 64], sizes = [2, 32], strides = [1, 1]} : vector<2x96xf32> to vector<2x32xf32>
    %220 = arith.mulf %218, %194 : vector<2x32xf32>
    %221 = arith.mulf %217, %216 : vector<2x32xf32>
    %222 = arith.addf %220, %221 : vector<2x32xf32>
    %223 = math.tanh %222 : vector<2x32xf32>
    %224 = arith.mulf %219, %223 : vector<2x32xf32>
    %225 = arith.truncf %224 : vector<2x32xf32> to vector<2x32xbf16>
    %226 = arith.index_cast %c7_i32 : i32 to index
    %c0_52 = arith.constant 0 : index
    %c0_53 = arith.constant 0 : index
    %227 = vector.load %arg4[%226, %c0_52, %c0_53] : memref<8x2x32xbf16, #tpu.memory_space<vmem>>, vector<1x2x32xbf16>
    %228 = vector.shape_cast %227 : vector<1x2x32xbf16> to vector<2x32xbf16>
    %229 = vector.shape_cast %225 : vector<2x32xbf16> to vector<1x2x32xbf16>
    tpu.vector_store %arg4[%226, %c0_52, %c0_53], %229 {strides = array<i32>} : memref<8x2x32xbf16, #tpu.memory_space<vmem>>, vector<1x2x32xbf16>,
    %c8_i32 = arith.constant 8 : i32
    %c0_54 = arith.constant 0 : index
    %c0_55 = arith.constant 0 : index
    %230 = vector.load %arg5[%c0_54, %c0_55] : memref<2x32xf32, #tpu.memory_space<vmem>>, vector<2x32xf32>
    tpu.vector_store %arg5[%c0_54, %c0_55], %224 {strides = array<i32>} : memref<2x32xf32, #tpu.memory_space<vmem>>, vector<2x32xf32>,
    %c0_56 = arith.constant 0 : index
    %c0_57 = arith.constant 0 : index
    %231 = vector.load %arg6[%c0_56, %c0_57] : memref<2x32xf32, #tpu.memory_space<vmem>>, vector<2x32xf32>
    tpu.vector_store %arg6[%c0_56, %c0_57], %222 {strides = array<i32>} : memref<2x32xf32, #tpu.memory_space<vmem>>, vector<2x32xf32>,
    return
  }
  func.func @transform_0(%arg0: i32, %arg1: i32) -> (i32, i32, i32) {
    %c0_i32 = arith.constant 0 : i32
    %c0_i32_0 = arith.constant 0 : i32
    return %arg1, %arg0, %c0_i32 : i32, i32, i32
  }
  func.func @transform_1(%arg0: i32, %arg1: i32) -> (i32, i32) {
    %c0_i32 = arith.constant 0 : i32
    %c0_i32_0 = arith.constant 0 : i32
    %c0_i32_1 = arith.constant 0 : i32
    return %c0_i32, %c0_i32_0 : i32, i32
  }
  func.func @transform_2(%arg0: i32, %arg1: i32) -> (i32, i32, i32) {
    %c0_i32 = arith.constant 0 : i32
    %c0_i32_0 = arith.constant 0 : i32
    return %arg1, %arg0, %c0_i32 : i32, i32, i32
  }
}

</mosaic_0001>

<bundles_post_ra>
// kernel: lstm_forward_pallas.1
= control target key start
LH: loop header
LB: loop body
LE: loop exit
PB: predicated region body
PF: predicated region fallthrough
CT: control target
= control target key end

     0   :  { %vm16_vm0 = vcmask 254976   ;;  %v750_v1 = vmov 0.0   ;;  %vm38_vm1 = vcmask 261120   ;;  %s751_s14 = smov 32   ;;  %s752_s15 = smov 64   ;;  %s926_s1 = inlined_call_operand.vmem [shape: bf16[32,128], index: 1, kind: input, shape index: {}]   ;;  %s927_s0 = inlined_call_operand.vmem [shape: bf16[8,2,128], index: 0, kind: input, shape index: {}]   ;;  %s928_s2 = inlined_call_operand.vmem [shape: bf16[8,2,32], index: 2, kind: output, shape index: {}]  }
   0x1   :  { %v681_v0 = vld [vmem:[%s926_s1 + $0x8] sm:$0xff]  ;;  %17 = vst.msk [vmem:[#allocation2] sm:$0x3] %vm16_vm0, %v750_v1  ;;  %v680_v2 = vld [vmem:[%s926_s1] sm:$0xff] }
   0x2   :  { %18 = vst.msk [vmem:[#allocation3] sm:$0x3] %vm16_vm0, %v750_v1  ;;  %48 = vmatpush.bf16.msra.mxu0 %v681_v0  ;;  %125 = vmatpush.bf16.msra.mxu1 %v681_v0  ;;  %v55_v5 = vld [vmem:[%s927_s0] sm:$0x1]  ;;  %v653_v38 = vld [vmem:[%s927_s0 + $0x1] sm:$0x1] }
   0x3   :  { %198 = vmatpush.bf16.msra.mxu2 %v681_v0  ;;  %271 = vmatpush.bf16.msra.mxu3 %v681_v0  ;;  %v56_v6 = vunpack.c.l.bf16 %v55_v5  ;;  %v134_v39 = vunpack.c.l.bf16 %v653_v38  ;;  %v657_v5 = vld [vmem:[%s927_s0 + $0x2] sm:$0x1] }
   0x6   :  { %49 = vmatpush.bf16.msra.mxu0 %v680_v2  ;;  %126 = vmatpush.bf16.msra.mxu1 %v680_v2 }
   0x7   :  { %199 = vmatpush.bf16.msra.mxu2 %v680_v2  ;;  %272 = vmatpush.bf16.msra.mxu3 %v680_v2 }
   0x8   :  { %v23_v3 = vld [vmem:[#allocation2] sm:$0x3] }
   0x9   :  { %v25_v4 = vpack.c.bf16 %v23_v3, %v23_v3  ;;  %v24_v11 = vld [vmem:[#allocation3] sm:$0x3] }
   0xa   :  { %344 = vmatpush.bf16.msrb.mxu0 %v681_v0  ;;  %417 = vmatpush.bf16.msrb.mxu1 %v681_v0 }
   0xb   :  { %490 = vmatpush.bf16.msrb.mxu2 %v681_v0  ;;  %563 = vmatpush.bf16.msrb.mxu3 %v681_v0 }
   0xc   :  { %650 = vmatmul.msk.bf16.vlgmr.msra.gmra.mxu0 %vm38_vm1, %v25_v4 }
   0xe   :  { %345 = vmatpush.bf16.msrb.mxu0 %v680_v2  ;;  %418 = vmatpush.bf16.msrb.mxu1 %v680_v2 }
   0xf   :  { %491 = vmatpush.bf16.msrb.mxu2 %v680_v2  ;;  %564 = vmatpush.bf16.msrb.mxu3 %v680_v2 }
  0x89   :  { %v51_v7 = vpop.f32.mrf.mxu0 }
  0x8a   :  { %v57_v8 = vadd.f32 %v56_v6, %v51_v7  ;;  %v207_v6 = vunpack.c.l.bf16 %v657_v5  ;;  %v665_v5 = vld [vmem:[%s927_s0 + $0x4] sm:$0x1] }
  0x8c   :  { %686 = vtanh.f32 %v57_v8  ;;  %v651_v12 = vmul.f32 -1.442695, %v57_v8 }
  0x8e   :  { %688 = vpow2.f32 %v651_v12 }
  0x91   :  { %v53_v9 = vpop.f32.mrf.mxu0 }
  0x92   :  { %v687_v10 = vpop.eup %686 }
  0x93   :  { %84 = vrot.lane.b32.xlu0 %v687_v10, %s751_s14 }
  0x94   :  { %v689_v13 = vpop.eup %688 }
  0x95   :  { %v61_v14 = vadd.f32 1.0, %v689_v13 }
  0x97   :  { %690 = vrcp.f32 %v61_v14  ;;  %v73_v20 = vand.u32 2147483648, %v61_v14  ;;  %vm67_vm3 = vweird.f32 %v61_v14  ;;  %v71_v21 = vand.u32 2147483647, %v61_v14 }
  0x99   :  { %v74_v23 = vor.u32 1.1754944e-38, %v73_v20  ;;  %vm72_vm5 = vcmp.eq.f32.partialorder %v71_v21, 8.507059e+37 }
  0x9b   :  { %79 = vrot.lane.b32.xlu0 %v24_v11, %s751_s14 }
  0x9d   :  { %v691_v15 = vpop.eup %690 }
  0x9e   :  { %v63_v16 = vmul.f32 %v691_v15, %v61_v14  ;;  %vm68_vm2 = vweird.f32 %v691_v15 }
  0x9f   :  { %vm69_vm4 = vmor %vm67_vm3, %vm68_vm2 }
  0xa0   :  { %v64_v17 = vsub.f32 1.0, %v63_v16 }
  0xa2   :  { %v65_v18 = vmul.f32 %v691_v15, %v64_v17 }
  0xa4   :  { %v66_v19 = vadd.f32 %v691_v15, %v65_v18 }
  0xa6   :  { %v70_v22 = vsel %vm69_vm4, %v691_v15, %v66_v19 }
  0xa7   :  { %v75_v25 = vsel %vm72_vm5, %v74_v23, %v70_v22 }
 0x105   :  { %v85_v24 = vpop.permute.xlu0 %84 }
 0x106   :  { %v87_v26 = vmul.f32 %v85_v24, %v75_v25 }
 0x108   :  { %89 = vrot.lane.b32.xlu1 %v87_v26, %s751_s14 }
 0x10d   :  { %v80_v27 = vpop.permute.xlu0 %79 }
 0x10e   :  { %v82_v28 = vmul.f32 %v80_v27, %v75_v25 }
 0x17a   :  { %v90_v29 = vpop.permute.xlu1 %89 }
 0x17b   :  { %v92_v30 = vadd.f32 %v90_v29, %v82_v28 }
 0x17d   :  { %692 = vtanh.f32 %v92_v30 }
 0x183   :  { %v693_v31 = vpop.eup %692 }
 0x184   :  { %95 = vrot.lane.b32.xlu1 %v693_v31, %s751_s14 }
 0x1f6   :  { %v96_v32 = vpop.permute.xlu1 %95 }
 0x1f7   :  { %v98_v33 = vmul.f32 %v96_v32, %v75_v25 }
 0x1f9   :  { %v785_v34 = vpack.c.bf16 %v98_v33, %v98_v33 }
 0x1fb   :  { %v112_v35 = vunpack.c.l.b16 %v785_v34 }
 0x1fd   :  { %v113_v36 = vpack.c.b16 %v112_v35, %v112_v35 }
 0x1ff   :  { %114 = vrot.lane.b32.xlu2 %v113_v36, %s752_s15 }
 0x259   :  { %v115_v37 = vpop.permute.xlu2 %114 }
 0x25a   :  { %652 = vmatmul.msk.bf16.vlgmr.msra.gmra.mxu1 %vm38_vm1, %v115_v37  ;;  %v661_v37 = vld [vmem:[%s927_s0 + $0x3] sm:$0x1] }
 0x25b   :  { %v280_v38 = vunpack.c.l.bf16 %v661_v37 }
 0x2d7   :  { %v128_v40 = vpop.f32.mrf.mxu1 }
 0x2d8   :  { %v135_v41 = vadd.f32 %v134_v39, %v128_v40 }
 0x2da   :  { %694 = vtanh.f32 %v135_v41  ;;  %v654_v44 = vmul.f32 -1.442695, %v135_v41 }
 0x2dc   :  { %696 = vpow2.f32 %v654_v44 }
 0x2df   :  { %v130_v42 = vpop.f32.mrf.mxu1 }
 0x2e0   :  { %v695_v43 = vpop.eup %694 }
 0x2e1   :  { %158 = vrot.lane.b32.xlu2 %v695_v43, %s751_s14 }
 0x2e2   :  { %v697_v45 = vpop.eup %696 }
 0x2e3   :  { %v139_v46 = vadd.f32 1.0, %v697_v45 }
 0x2e5   :  { %698 = vrcp.f32 %v139_v46  ;;  %v151_v52 = vand.u32 2147483648, %v139_v46  ;;  %vm145_vm7 = vweird.f32 %v139_v46  ;;  %v149_v53 = vand.u32 2147483647, %v139_v46 }
 0x2e7   :  { %v152_v55 = vor.u32 1.1754944e-38, %v151_v52  ;;  %vm150_vm9 = vcmp.eq.f32.partialorder %v149_v53, 8.507059e+37 }
 0x2eb   :  { %v699_v47 = vpop.eup %698 }
 0x2ec   :  { %v141_v48 = vmul.f32 %v699_v47, %v139_v46  ;;  %vm146_vm6 = vweird.f32 %v699_v47 }
 0x2ed   :  { %vm147_vm8 = vmor %vm145_vm7, %vm146_vm6 }
 0x2ee   :  { %v142_v49 = vsub.f32 1.0, %v141_v48 }
 0x2f0   :  { %v143_v50 = vmul.f32 %v699_v47, %v142_v49 }
 0x2f2   :  { %v144_v51 = vadd.f32 %v699_v47, %v143_v50 }
 0x2f4   :  { %v148_v54 = vsel %vm147_vm8, %v699_v47, %v144_v51 }
 0x2f5   :  { %v153_v57 = vsel %vm150_vm9, %v152_v55, %v148_v54 }
 0x2f6   :  { %v156_v59 = vmul.f32 %v153_v57, %v92_v30 }
 0x33b   :  { %v159_v56 = vpop.permute.xlu2 %158 }
 0x33c   :  { %v161_v58 = vmul.f32 %v159_v56, %v153_v57 }
 0x33e   :  { %163 = vrot.lane.b32.xlu0 %v161_v58, %s751_s14 }
 0x3b0   :  { %v164_v60 = vpop.permute.xlu0 %163 }
 0x3b1   :  { %v166_v61 = vadd.f32 %v164_v60, %v156_v59 }
 0x3b3   :  { %700 = vtanh.f32 %v166_v61 }
 0x3b9   :  { %v701_v62 = vpop.eup %700 }
 0x3ba   :  { %169 = vrot.lane.b32.xlu1 %v701_v62, %s751_s14 }
 0x42c   :  { %v170_v63 = vpop.permute.xlu1 %169 }
 0x42d   :  { %v172_v0 = vmul.f32 %v170_v63, %v153_v57 }
 0x42f   :  { %v796_v1 = vpack.c.bf16 %v172_v0, %v172_v0 }
 0x431   :  { %v185_v2 = vunpack.c.l.b16 %v796_v1 }
 0x433   :  { %v186_v3 = vpack.c.b16 %v185_v2, %v185_v2 }
 0x435   :  { %187 = vrot.lane.b32.xlu2 %v186_v3, %s752_s15 }
 0x48f   :  { %v188_v4 = vpop.permute.xlu2 %187 }
 0x490   :  { %656 = vmatmul.msk.bf16.vlgmr.msra.gmra.mxu2 %vm38_vm1, %v188_v4 }
 0x513   :  { %v201_v7 = vpop.f32.mrf.mxu2 }
 0x514   :  { %v208_v8 = vadd.f32 %v207_v6, %v201_v7  ;;  %v353_v6 = vunpack.c.l.bf16 %v665_v5 }
 0x516   :  { %702 = vtanh.f32 %v208_v8  ;;  %v658_v11 = vmul.f32 -1.442695, %v208_v8 }
 0x518   :  { %704 = vpow2.f32 %v658_v11 }
 0x51b   :  { %v203_v9 = vpop.f32.mrf.mxu2 }
 0x51c   :  { %v703_v10 = vpop.eup %702 }
 0x51d   :  { %231 = vrot.lane.b32.xlu0 %v703_v10, %s751_s14 }
 0x51e   :  { %v705_v12 = vpop.eup %704 }
 0x51f   :  { %v212_v13 = vadd.f32 1.0, %v705_v12 }
 0x521   :  { %706 = vrcp.f32 %v212_v13  ;;  %v224_v19 = vand.u32 2147483648, %v212_v13  ;;  %vm218_vm11 = vweird.f32 %v212_v13  ;;  %v222_v20 = vand.u32 2147483647, %v212_v13 }
 0x523   :  { %v225_v22 = vor.u32 1.1754944e-38, %v224_v19  ;;  %vm223_vm13 = vcmp.eq.f32.partialorder %v222_v20, 8.507059e+37 }
 0x527   :  { %v707_v14 = vpop.eup %706 }
 0x528   :  { %v214_v15 = vmul.f32 %v707_v14, %v212_v13  ;;  %vm219_vm10 = vweird.f32 %v707_v14 }
 0x529   :  { %vm220_vm12 = vmor %vm218_vm11, %vm219_vm10 }
 0x52a   :  { %v215_v16 = vsub.f32 1.0, %v214_v15 }
 0x52c   :  { %v216_v17 = vmul.f32 %v707_v14, %v215_v16 }
 0x52e   :  { %v217_v18 = vadd.f32 %v707_v14, %v216_v17 }
 0x530   :  { %v221_v21 = vsel %vm220_vm12, %v707_v14, %v217_v18 }
 0x531   :  { %v226_v24 = vsel %vm223_vm13, %v225_v22, %v221_v21 }
 0x532   :  { %v229_v26 = vmul.f32 %v226_v24, %v166_v61 }
 0x58f   :  { %v232_v23 = vpop.permute.xlu0 %231 }
 0x590   :  { %v234_v25 = vmul.f32 %v232_v23, %v226_v24 }
 0x592   :  { %236 = vrot.lane.b32.xlu1 %v234_v25, %s751_s14 }
 0x604   :  { %v237_v27 = vpop.permute.xlu1 %236 }
 0x605   :  { %v239_v28 = vadd.f32 %v237_v27, %v229_v26 }
 0x607   :  { %708 = vtanh.f32 %v239_v28 }
 0x60d   :  { %v709_v29 = vpop.eup %708 }
 0x60e   :  { %242 = vrot.lane.b32.xlu2 %v709_v29, %s751_s14 }
 0x668   :  { %v243_v30 = vpop.permute.xlu2 %242 }
 0x669   :  { %v245_v31 = vmul.f32 %v243_v30, %v226_v24 }
 0x66b   :  { %v807_v32 = vpack.c.bf16 %v245_v31, %v245_v31 }
 0x66d   :  { %v258_v33 = vunpack.c.l.b16 %v807_v32 }
 0x66f   :  { %v259_v35 = vpack.c.b16 %v258_v33, %v258_v33 }
 0x671   :  { %260 = vrot.lane.b32.xlu0 %v259_v35, %s752_s15 }
 0x6e3   :  { %v261_v36 = vpop.permute.xlu0 %260 }
 0x6e4   :  { %660 = vmatmul.msk.bf16.vlgmr.msra.gmra.mxu3 %vm38_vm1, %v261_v36 }
 0x767   :  { %v274_v39 = vpop.f32.mrf.mxu3 }
 0x768   :  { %v281_v40 = vadd.f32 %v280_v38, %v274_v39  ;;  %v669_v38 = vld [vmem:[%s927_s0 + $0x5] sm:$0x1] }
 0x769   :  { %v426_v39 = vunpack.c.l.bf16 %v669_v38 }
 0x76a   :  { %710 = vtanh.f32 %v281_v40  ;;  %v662_v43 = vmul.f32 -1.442695, %v281_v40 }
 0x76c   :  { %712 = vpow2.f32 %v662_v43 }
 0x76f   :  { %v276_v41 = vpop.f32.mrf.mxu3 }
 0x770   :  { %v711_v42 = vpop.eup %710 }
 0x771   :  { %304 = vrot.lane.b32.xlu1 %v711_v42, %s751_s14 }
 0x772   :  { %v713_v44 = vpop.eup %712 }
 0x773   :  { %v285_v45 = vadd.f32 1.0, %v713_v44 }
 0x775   :  { %714 = vrcp.f32 %v285_v45  ;;  %v297_v51 = vand.u32 2147483648, %v285_v45  ;;  %vm291_vm15 = vweird.f32 %v285_v45  ;;  %v295_v52 = vand.u32 2147483647, %v285_v45 }
 0x777   :  { %v298_v54 = vor.u32 1.1754944e-38, %v297_v51  ;;  %vm296_vm3 = vcmp.eq.f32.partialorder %v295_v52, 8.507059e+37 }
 0x77b   :  { %v715_v46 = vpop.eup %714 }
 0x77c   :  { %v287_v47 = vmul.f32 %v715_v46, %v285_v45  ;;  %vm292_vm14 = vweird.f32 %v715_v46 }
 0x77d   :  { %vm293_vm2 = vmor %vm291_vm15, %vm292_vm14 }
 0x77e   :  { %v288_v48 = vsub.f32 1.0, %v287_v47 }
 0x780   :  { %v289_v49 = vmul.f32 %v715_v46, %v288_v48 }
 0x782   :  { %v290_v50 = vadd.f32 %v715_v46, %v289_v49 }
 0x784   :  { %v294_v53 = vsel %vm293_vm2, %v715_v46, %v290_v50  ;;  %vm102_vm2 = vcmask 1040384  }
 0x785   :  { %v299_v56 = vsel %vm296_vm3, %v298_v54, %v294_v53 }
 0x786   :  { %v302_v58 = vmul.f32 %v299_v56, %v239_v28 }
 0x7e3   :  { %v305_v55 = vpop.permute.xlu1 %304 }
 0x7e4   :  { %v307_v57 = vmul.f32 %v305_v55, %v299_v56 }
 0x7e6   :  { %309 = vrot.lane.b32.xlu2 %v307_v57, %s751_s14 }
 0x840   :  { %v310_v59 = vpop.permute.xlu2 %309 }
 0x841   :  { %v312_v60 = vadd.f32 %v310_v59, %v302_v58 }
 0x843   :  { %716 = vtanh.f32 %v312_v60 }
 0x849   :  { %v717_v61 = vpop.eup %716 }
 0x84a   :  { %315 = vrot.lane.b32.xlu0 %v717_v61, %s751_s14 }
 0x8bc   :  { %v316_v62 = vpop.permute.xlu0 %315 }
 0x8bd   :  { %v318_v63 = vmul.f32 %v316_v62, %v299_v56 }
 0x8bf   :  { %v818_v0 = vpack.c.bf16 %v318_v63, %v318_v63 }
 0x8c1   :  { %v331_v2 = vunpack.c.l.b16 %v818_v0 }
 0x8c3   :  { %v332_v3 = vpack.c.b16 %v331_v2, %v331_v2 }
 0x8c5   :  { %333 = vrot.lane.b32.xlu1 %v332_v3, %s752_s15 }
 0x937   :  { %v334_v4 = vpop.permute.xlu1 %333 }
 0x938   :  { %664 = vmatmul.msk.bf16.vlgmr.msrb.gmra.mxu0 %vm38_vm1, %v334_v4 }
 0x9b5   :  { %v347_v7 = vpop.f32.mrf.mxu0 }
 0x9b6   :  { %v354_v8 = vadd.f32 %v353_v6, %v347_v7  ;;  %v673_v7 = vld [vmem:[%s927_s0 + $0x6] sm:$0x1] }
 0x9b8   :  { %718 = vtanh.f32 %v354_v8  ;;  %v666_v11 = vmul.f32 -1.442695, %v354_v8  ;;  %v499_v8 = vunpack.c.l.bf16 %v673_v7 }
 0x9ba   :  { %720 = vpow2.f32 %v666_v11 }
 0x9bd   :  { %v349_v9 = vpop.f32.mrf.mxu0 }
 0x9be   :  { %v719_v10 = vpop.eup %718 }
 0x9bf   :  { %377 = vrot.lane.b32.xlu2 %v719_v10, %s751_s14 }
 0x9c0   :  { %v721_v12 = vpop.eup %720 }
 0x9c1   :  { %v358_v13 = vadd.f32 1.0, %v721_v12 }
 0x9c3   :  { %722 = vrcp.f32 %v358_v13  ;;  %v370_v19 = vand.u32 2147483648, %v358_v13  ;;  %vm364_vm5 = vweird.f32 %v358_v13  ;;  %v368_v20 = vand.u32 2147483647, %v358_v13 }
 0x9c5   :  { %v371_v22 = vor.u32 1.1754944e-38, %v370_v19  ;;  %vm369_vm7 = vcmp.eq.f32.partialorder %v368_v20, 8.507059e+37 }
 0x9c9   :  { %v723_v14 = vpop.eup %722 }
 0x9ca   :  { %v360_v15 = vmul.f32 %v723_v14, %v358_v13  ;;  %vm365_vm4 = vweird.f32 %v723_v14 }
 0x9cb   :  { %vm366_vm6 = vmor %vm364_vm5, %vm365_vm4 }
 0x9cc   :  { %v361_v16 = vsub.f32 1.0, %v360_v15 }
 0x9ce   :  { %v362_v17 = vmul.f32 %v723_v14, %v361_v16 }
 0x9d0   :  { %v363_v18 = vadd.f32 %v723_v14, %v362_v17 }
 0x9d2   :  { %v367_v21 = vsel %vm366_vm6, %v723_v14, %v363_v18  ;;  %vm110_vm6 = vcmask 253952  }
 0x9d3   :  { %v372_v24 = vsel %vm369_vm7, %v371_v22, %v367_v21 }
 0x9d4   :  { %v375_v26 = vmul.f32 %v372_v24, %v312_v60 }
 0xa19   :  { %v378_v23 = vpop.permute.xlu2 %377 }
 0xa1a   :  { %v380_v25 = vmul.f32 %v378_v23, %v372_v24 }
 0xa1c   :  { %382 = vrot.lane.b32.xlu0 %v380_v25, %s751_s14 }
 0xa8e   :  { %v383_v27 = vpop.permute.xlu0 %382 }
 0xa8f   :  { %v385_v28 = vadd.f32 %v383_v27, %v375_v26 }
 0xa91   :  { %724 = vtanh.f32 %v385_v28 }
 0xa97   :  { %v725_v29 = vpop.eup %724 }
 0xa98   :  { %388 = vrot.lane.b32.xlu1 %v725_v29, %s751_s14 }
 0xb0a   :  { %v389_v30 = vpop.permute.xlu1 %388 }
 0xb0b   :  { %v391_v31 = vmul.f32 %v389_v30, %v372_v24 }
 0xb0d   :  { %v829_v33 = vpack.c.bf16 %v391_v31, %v391_v31 }
 0xb0f   :  { %v404_v35 = vunpack.c.l.b16 %v829_v33 }
 0xb11   :  { %v405_v36 = vpack.c.b16 %v404_v35, %v404_v35 }
 0xb13   :  { %406 = vrot.lane.b32.xlu2 %v405_v36, %s752_s15 }
 0xb6d   :  { %v407_v37 = vpop.permute.xlu2 %406 }
 0xb6e   :  { %668 = vmatmul.msk.bf16.vlgmr.msrb.gmra.mxu1 %vm38_vm1, %v407_v37 }
 0xbeb   :  { %v420_v40 = vpop.f32.mrf.mxu1 }
 0xbec   :  { %v427_v41 = vadd.f32 %v426_v39, %v420_v40 }
 0xbee   :  { %726 = vtanh.f32 %v427_v41  ;;  %v670_v44 = vmul.f32 -1.442695, %v427_v41  ;;  %v677_v41 = vld [vmem:[%s927_s0 + $0x7] sm:$0x1] }
 0xbf0   :  { %728 = vpow2.f32 %v670_v44 }
 0xbf3   :  { %v422_v42 = vpop.f32.mrf.mxu1 }
 0xbf4   :  { %v727_v43 = vpop.eup %726  ;;  %v572_v42 = vunpack.c.l.bf16 %v677_v41 }
 0xbf5   :  { %450 = vrot.lane.b32.xlu0 %v727_v43, %s751_s14 }
 0xbf6   :  { %v729_v45 = vpop.eup %728 }
 0xbf7   :  { %v431_v46 = vadd.f32 1.0, %v729_v45 }
 0xbf9   :  { %730 = vrcp.f32 %v431_v46  ;;  %v443_v52 = vand.u32 2147483648, %v431_v46  ;;  %vm437_vm9 = vweird.f32 %v431_v46  ;;  %v441_v53 = vand.u32 2147483647, %v431_v46 }
 0xbfb   :  { %v444_v55 = vor.u32 1.1754944e-38, %v443_v52  ;;  %vm442_vm11 = vcmp.eq.f32.partialorder %v441_v53, 8.507059e+37 }
 0xbff   :  { %v731_v47 = vpop.eup %730 }
 0xc00   :  { %v433_v48 = vmul.f32 %v731_v47, %v431_v46  ;;  %vm438_vm8 = vweird.f32 %v731_v47 }
 0xc01   :  { %vm439_vm10 = vmor %vm437_vm9, %vm438_vm8 }
 0xc02   :  { %v434_v49 = vsub.f32 1.0, %v433_v48 }
 0xc04   :  { %v435_v50 = vmul.f32 %v731_v47, %v434_v49  ;;  %v321_v49 = vrot.slane %v818_v0, 3 }
 0xc06   :  { %v436_v51 = vadd.f32 %v731_v47, %v435_v50  ;;  %v324_v50 = vsel %vm102_vm2, %v818_v0, %v321_v49 }
 0xc08   :  { %v440_v54 = vsel %vm439_vm10, %v731_v47, %v436_v51  ;;  %v101_v47 = vrot.slane %v785_v34, 3 }
 0xc09   :  { %v445_v57 = vsel %vm442_vm11, %v444_v55, %v440_v54 }
 0xc0a   :  { %v448_v59 = vmul.f32 %v445_v57, %v385_v28  ;;  %v105_v48 = vsel %vm102_vm2, %v785_v34, %v101_v47 }
 0xc67   :  { %v451_v56 = vpop.permute.xlu0 %450 }
 0xc68   :  { %v453_v58 = vmul.f32 %v451_v56, %v445_v57 }
 0xc6a   :  { %455 = vrot.lane.b32.xlu1 %v453_v58, %s751_s14 }
 0xcdc   :  { %v456_v60 = vpop.permute.xlu1 %455 }
 0xcdd   :  { %v458_v61 = vadd.f32 %v456_v60, %v448_v59 }
 0xcdf   :  { %732 = vtanh.f32 %v458_v61 }
 0xce5   :  { %v733_v62 = vpop.eup %732 }
 0xce6   :  { %461 = vrot.lane.b32.xlu2 %v733_v62, %s751_s14 }
 0xd40   :  { %v462_v63 = vpop.permute.xlu2 %461 }
 0xd41   :  { %v464_v2 = vmul.f32 %v462_v63, %v445_v57 }
 0xd43   :  { %v840_v3 = vpack.c.bf16 %v464_v2, %v464_v2 }
 0xd45   :  { %v477_v4 = vunpack.c.l.b16 %v840_v3 }
 0xd47   :  { %v478_v5 = vpack.c.b16 %v477_v4, %v477_v4 }
 0xd49   :  { %479 = vrot.lane.b32.xlu0 %v478_v5, %s752_s15  ;;  %v175_v5 = vrot.slane %v796_v1, 3 }
 0xd4b   :  { %v178_v7 = vsel %vm102_vm2, %v796_v1, %v175_v5 }
 0xdbb   :  { %v480_v6 = vpop.permute.xlu0 %479 }
 0xdbc   :  { %672 = vmatmul.msk.bf16.vlgmr.msrb.gmra.mxu2 %vm38_vm1, %v480_v6 }
 0xe3f   :  { %v493_v9 = vpop.f32.mrf.mxu2 }
 0xe40   :  { %v500_v10 = vadd.f32 %v499_v8, %v493_v9  ;;  %v394_v8 = vrot.slane %v829_v33, 3 }
 0xe42   :  { %734 = vtanh.f32 %v500_v10  ;;  %v674_v13 = vmul.f32 -1.442695, %v500_v10  ;;  %v397_v10 = vsel %vm102_vm2, %v829_v33, %v394_v8  ;;  %v248_v33 = vrot.slane %v807_v32, 3 }
 0xe44   :  { %736 = vpow2.f32 %v674_v13 }
 0xe47   :  { %v495_v11 = vpop.f32.mrf.mxu2 }
 0xe48   :  { %v735_v12 = vpop.eup %734 }
 0xe49   :  { %523 = vrot.lane.b32.xlu1 %v735_v12, %s751_s14 }
 0xe4a   :  { %v737_v14 = vpop.eup %736 }
 0xe4b   :  { %v504_v15 = vadd.f32 1.0, %v737_v14 }
 0xe4d   :  { %738 = vrcp.f32 %v504_v15  ;;  %v516_v21 = vand.u32 2147483648, %v504_v15  ;;  %vm510_vm13 = vweird.f32 %v504_v15  ;;  %v514_v22 = vand.u32 2147483647, %v504_v15 }
 0xe4f   :  { %v517_v24 = vor.u32 1.1754944e-38, %v516_v21  ;;  %vm515_vm15 = vcmp.eq.f32.partialorder %v514_v22, 8.507059e+37 }
 0xe53   :  { %v739_v16 = vpop.eup %738 }
 0xe54   :  { %v506_v17 = vmul.f32 %v739_v16, %v504_v15  ;;  %vm511_vm12 = vweird.f32 %v739_v16 }
 0xe55   :  { %vm512_vm14 = vmor %vm510_vm13, %vm511_vm12 }
 0xe56   :  { %v507_v18 = vsub.f32 1.0, %v506_v17  ;;  %v251_v17 = vsel %vm102_vm2, %v807_v32, %v248_v33 }
 0xe58   :  { %v508_v19 = vmul.f32 %v739_v16, %v507_v18  ;;  %v467_v18 = vrot.slane %v840_v3, 3 }
 0xe5a   :  { %v509_v20 = vadd.f32 %v739_v16, %v508_v19  ;;  %v470_v19 = vsel %vm102_vm2, %v840_v3, %v467_v18 }
 0xe5c   :  { %v513_v23 = vsel %vm512_vm14, %v739_v16, %v509_v20 }
 0xe5d   :  { %v518_v26 = vsel %vm515_vm15, %v517_v24, %v513_v23 }
 0xe5e   :  { %v521_v28 = vmul.f32 %v518_v26, %v458_v61 }
 0xebb   :  { %v524_v25 = vpop.permute.xlu1 %523 }
 0xebc   :  { %v526_v27 = vmul.f32 %v524_v25, %v518_v26 }
 0xebe   :  { %528 = vrot.lane.b32.xlu2 %v526_v27, %s751_s14 }
 0xf18   :  { %v529_v29 = vpop.permute.xlu2 %528 }
 0xf19   :  { %v850_v30 = vadd.f32 %v529_v29, %v521_v28 }
 0xf1b   :  { %740 = vtanh.f32 %v850_v30 }
 0xf21   :  { %v741_v31 = vpop.eup %740 }
 0xf22   :  { %534 = vrot.lane.b32.xlu0 %v741_v31, %s751_s14 }
 0xf94   :  { %v535_v35 = vpop.permute.xlu0 %534 }
 0xf95   :  { %v537_v36 = vmul.f32 %v535_v35, %v518_v26 }
 0xf97   :  { %v538_v37 = vpack.c.bf16 %v537_v36, %v537_v36 }
 0xf99   :  { %v550_v38 = vunpack.c.l.b16 %v538_v37  ;;  %v540_v51 = vrot.slane %v538_v37, 3 }
 0xf9b   :  { %v551_v39 = vpack.c.b16 %v550_v38, %v550_v38  ;;  %v543_v52 = vsel %vm102_vm2, %v538_v37, %v540_v51 }
 0xf9d   :  { %552 = vrot.lane.b32.xlu1 %v551_v39, %s752_s15 }
0x100f   :  { %v553_v40 = vpop.permute.xlu1 %552 }
0x1010   :  { %676 = vmatmul.msk.bf16.vlgmr.msrb.gmra.mxu3 %vm38_vm1, %v553_v40 }
0x1093   :  { %v566_v43 = vpop.f32.mrf.mxu3 }
0x1094   :  { %v573_v44 = vadd.f32 %v572_v42, %v566_v43 }
0x1096   :  { %742 = vtanh.f32 %v573_v44  ;;  %v678_v53 = vmul.f32 -1.442695, %v573_v44 }
0x1098   :  { %744 = vpow2.f32 %v678_v53 }
0x109b   :  { %v568_v45 = vpop.f32.mrf.mxu3 }
0x109c   :  { %v743_v46 = vpop.eup %742 }
0x109d   :  { %596 = vrot.lane.b32.xlu2 %v743_v46, %s751_s14 }
0x109e   :  { %v745_v54 = vpop.eup %744 }
0x109f   :  { %v577_v55 = vadd.f32 1.0, %v745_v54 }
0x10a1   :  { %746 = vrcp.f32 %v577_v55  ;;  %v589_v60 = vand.u32 2147483648, %v577_v55  ;;  %vm583_vm3 = vweird.f32 %v577_v55  ;;  %v587_v0 = vand.u32 2147483647, %v577_v55 }
0x10a3   :  { %v590_v62 = vor.u32 1.1754944e-38, %v589_v60  ;;  %vm588_vm5 = vcmp.eq.f32.partialorder %v587_v0, 8.507059e+37 }
0x10a5   :  { %107 = vrot.lane.b32.xlu2 %v105_v48, %s752_s15 }
0x10a7   :  { %v747_v34 = vpop.eup %746 }
0x10a8   :  { %v579_v56 = vmul.f32 %v747_v34, %v577_v55  ;;  %vm584_vm1 = vweird.f32 %v747_v34 }
0x10a9   :  { %vm585_vm4 = vmor %vm583_vm3, %vm584_vm1 }
0x10aa   :  { %v580_v57 = vsub.f32 1.0, %v579_v56 }
0x10ac   :  { %v581_v58 = vmul.f32 %v747_v34, %v580_v57 }
0x10ad   :  { %326 = vrot.lane.b32.xlu2 %v324_v50, %s752_s15 }
0x10ae   :  { %v582_v59 = vadd.f32 %v747_v34, %v581_v58 }
0x10b0   :  { %v586_v61 = vsel %vm585_vm4, %v747_v34, %v582_v59 }
0x10b1   :  { %v591_v2 = vsel %vm588_vm5, %v590_v62, %v586_v61 }
0x10b2   :  { %v594_v1 = vmul.f32 %v591_v2, %v850_v30 }
0x10b5   :  { %545 = vrot.lane.b32.xlu2 %v543_v52, %s752_s15 }
0x10f7   :  { %v597_v63 = vpop.permute.xlu2 %596 }
0x10f8   :  { %v599_v4 = vmul.f32 %v597_v63, %v591_v2 }
0x10fa   :  { %601 = vrot.lane.b32.xlu0 %v599_v4, %s751_s14 }
0x10ff   :  { %v108_v6 = vpop.permute.xlu2 %107 }
0x1100   :  { %111 = vst.msk [vmem:[%s928_s2] sm:$0x1] %vm110_vm6, %v108_v6 }
0x1102   :  { %180 = vrot.lane.b32.xlu0 %v178_v7, %s752_s15 }
0x1107   :  { %v327_v9 = vpop.permute.xlu2 %326 }
0x1108   :  { %663 = vst.msk [vmem:[%s928_s2 + $0x3] sm:$0x1] %vm110_vm6, %v327_v9 }
0x110a   :  { %399 = vrot.lane.b32.xlu0 %v397_v10, %s752_s15 }
0x110f   :  { %v546_v11 = vpop.permute.xlu2 %545 }
0x1110   :  { %675 = vst.msk [vmem:[%s928_s2 + $0x6] sm:$0x1] %vm110_vm6, %v546_v11 }
0x116c   :  { %v602_v12 = vpop.permute.xlu0 %601 }
0x116d   :  { %v604_v13 = vadd.f32 %v602_v12, %v594_v1 }
0x116f   :  { %748 = vtanh.f32 %v604_v13 }
0x1174   :  { %v181_v14 = vpop.permute.xlu0 %180 }
0x1175   :  { %v749_v15 = vpop.eup %748  ;;  %655 = vst.msk [vmem:[%s928_s2 + $0x1] sm:$0x1] %vm110_vm6, %v181_v14 }
0x1176   :  { %607 = vrot.lane.b32.xlu1 %v749_v15, %s751_s14  ;;  %s753_s14 = smov 96  }
0x117c   :  { %v400_v16 = vpop.permute.xlu0 %399 }
0x117d   :  { %667 = vst.msk [vmem:[%s928_s2 + $0x4] sm:$0x1] %vm110_vm6, %v400_v16 }
0x117e   :  { %253 = vrot.lane.b32.xlu1 %v251_v17, %s752_s15 }
0x1186   :  { %472 = vrot.lane.b32.xlu1 %v470_v19, %s752_s15 }
0x11e8   :  { %v608_v20 = vpop.permute.xlu1 %607 }
0x11e9   :  { %v610_v21 = vmul.f32 %v608_v20, %v591_v2 }
0x11eb   :  { %v611_v22 = vpack.c.bf16 %v610_v21, %v610_v21  ;;  %624 = vst [vmem:[#allocation1] ss:$4 sm:$0xff] %v610_v21 }
0x11ed   :  { %v613_v23 = vrot.slane %v611_v22, 3 }
0x11ef   :  { %v616_v24 = vsel %vm102_vm2, %v611_v22, %v613_v23 }
0x11f0   :  { %618 = vrot.lane.b32.xlu0 %v616_v24, %s752_s15  ;;  %v254_v25 = vpop.permute.xlu1 %253 }
0x11f1   :  { %659 = vst.msk [vmem:[%s928_s2 + $0x2] sm:$0x1] %vm110_vm6, %v254_v25 }
0x11f2   :  { %v625_v32 = vld.sshfl [vmem:[#allocation1] sm:$0xff pattern:$0x73625140] }
0x11f3   :  { %632 = vst [vmem:[#allocation1] ss:$4 sm:$0xff] %v604_v13  ;;  %626 = vrot.lane.b32.xlu1 %v625_v32, %s752_s15 }
0x11f8   :  { %v473_v3 = vpop.permute.xlu1 %472 }
0x11f9   :  { %671 = vst.msk [vmem:[%s928_s2 + $0x5] sm:$0x1] %vm110_vm6, %v473_v3 }
0x11fa   :  { %v633_v26 = vld.sshfl [vmem:[#allocation1] sm:$0xff pattern:$0x73625140] }
0x11fb   :  { %634 = vrot.lane.b32.xlu2 %v633_v26, %s753_s14 }
0x1255   :  { %v635_v27 = vpop.permute.xlu2 %634 }
0x1256   :  { %637 = vst.msk [vmem:[#allocation3] sm:$0x3] %vm16_vm0, %v635_v27 }
0x1262   :  { %v619_v28 = vpop.permute.xlu0 %618 }
0x1263   :  { %679 = vst.msk [vmem:[%s928_s2 + $0x7] sm:$0x1] %vm110_vm6, %v619_v28 }
0x1265   :  { %v627_v29 = vpop.permute.xlu1 %626 }
0x1266   :  { %630 = vst.msk [vmem:[#allocation2] sm:$0x3] %vm16_vm0, %v627_v29 }

</bundles_post_ra>
